<compile_context>
chip_gen: v7x
topology: tpu7x:2x2x1
jax: 0.10.0
libtpu: 0.0.40
codegen_flags: <defaults>
</compile_context>

<pallas_src>
import functools

import jax
import jax.numpy as jnp
from jax.experimental import pallas as pl
from jax.experimental.pallas import tpu as pltpu


def _lane_fold(x, lanes=128):
    """Sum (..., TILE) into (..., lanes) lane-aligned chunks (pure VPU adds)."""
    tile = x.shape[-1]
    acc = x[..., :lanes]
    for k in range(1, tile // lanes):
        acc = acc + x[..., k * lanes:(k + 1) * lanes]
    return acc


def _gdl_tile_kernel(pred_ref, labels_ref, partial_ref,
                     inter_acc, count_acc, psum_acc, *, hw, pad):
    # pred_ref:    (1, C, TILE) raw logits (any float dtype), softmax over C
    # labels_ref:  (1, 1, TILE) int class labels (padded pixels hold class C)
    # partial_ref: (1, 1, C, 3) per-(image, split) [intersection, count, prob_sum]
    # *_acc:       (C, 128) f32 lane-chunk accumulators (VMEM scratch)
    s_id = pl.program_id(1)
    t = pl.program_id(2)
    num_t = pl.num_programs(2)

    @pl.when(t == 0)
    def _init():
        inter_acc[...] = jnp.zeros_like(inter_acc)
        count_acc[...] = jnp.zeros_like(count_acc)
        psum_acc[...] = jnp.zeros_like(psum_acc)

    logits = pred_ref[0].astype(jnp.float32)                 # (C, TILE)
    num_classes, tile = logits.shape

    # Numerically-stable softmax over channels: one reciprocal per pixel (EUP)
    # plus C multiplies instead of C per-element VPU divides.
    m = jnp.max(logits, axis=0, keepdims=True)               # (1, TILE)
    e = jnp.exp(logits - m)
    denom = jnp.sum(e, axis=0, keepdims=True)                # (1, TILE)
    p = e * pl.reciprocal(denom)                             # exact reciprocal

    labels = labels_ref[0].astype(jnp.int32)                 # (1, TILE)
    class_ids = jax.lax.broadcasted_iota(jnp.int32, (num_classes, tile), 0)
    one_hot = (labels == class_ids).astype(jnp.float32)      # in-kernel one-hot

    if pad:
        # Padded pixels: their one-hot row is already all-zero (label == C);
        # also remove their softmax mass from the probability sum.
        lane = jax.lax.broadcasted_iota(jnp.int32, (1, tile), 1)
        base = (s_id * num_t + t) * tile
        p = p * (base + lane < hw).astype(jnp.float32)

    inter_acc[...] += _lane_fold(p * one_hot)
    count_acc[...] += _lane_fold(one_hot)
    psum_acc[...] += _lane_fold(p)

    @pl.when(t == num_t - 1)
    def _finalize():
        # One cross-lane reduce + one narrow store per (image, split).
        inter = jnp.sum(inter_acc[...], axis=1, keepdims=True)   # (C, 1)
        count = jnp.sum(count_acc[...], axis=1, keepdims=True)
        psum = jnp.sum(psum_acc[...], axis=1, keepdims=True)
        partial_ref[...] = jnp.concatenate([inter, count, psum], axis=1)[None, None]


def _choose_hw_tile(num_classes, itemsize):
    """Largest 128-multiple HW tile within a per-block byte budget (VMEM-aware)."""
    # ~1 MiB pred blocks are safe on v7x (64 MiB VMEM/TC); allow 2 MiB on
    # 128-MiB-VMEM parts (v5e/v6e).  With 2x input buffering plus ~5 f32 temps
    # of block size the per-step footprint stays well under the 32 MiB scoped
    # VMEM default, so no vmem_limit_bytes override is needed.
    budget = 1 << 20
    try:
        if pltpu.get_tpu_info().vmem_capacity_bytes >= (100 << 20):
            budget = 2 << 20
    except Exception:
        pass
    tile = (budget // max(1, num_classes * itemsize)) // 128 * 128
    return int(max(128, min(tile, 8192)))


def generalized_dice_loss(y_pred, y_true, hw_tile=None, hw_splits=None, eps=1e-9):
    """y_pred: (N, C, H, W) float logits; y_true: (N, H, W) int labels in [0, C)."""
    N, C, H, W = y_pred.shape
    HW = H * W
    n_lane_tiles = -(-HW // 128)             # ceil(HW / 128)

    # Split the HW reduction across >1 'parallel' grid programs when the batch
    # alone cannot feed both v7x TensorCores (no-op on single-TC v5e/v6e).
    if hw_splits is None:
        hw_splits = 2 if (N == 1 and n_lane_tiles >= 2) else 1
    hw_splits = max(1, min(int(hw_splits), n_lane_tiles))

    if hw_tile is None:
        hw_tile = _choose_hw_tile(C, jnp.dtype(y_pred.dtype).itemsize)
    assert hw_tile >= 128 and hw_tile % 128 == 0, hw_tile
    # Never larger than one split's share of the (128-padded) image.
    per_split = -(-n_lane_tiles // hw_splits) * 128
    hw_tile = min(hw_tile, per_split)

    chunk = hw_tile * hw_splits
    hw_padded = -(-HW // chunk) * chunk
    num_tiles = hw_padded // hw_tile
    tiles_per_split = num_tiles // hw_splits
    pad = hw_padded != HW

    pred = y_pred.reshape(N, C, HW)          # keep incoming dtype (bf16 passes through)
    labels = y_true.reshape(N, HW)
    if pad:
        pred = jnp.pad(pred, ((0, 0), (0, 0), (0, hw_padded - HW)))
        labels = jnp.pad(labels, ((0, 0), (0, hw_padded - HW)), constant_values=C)
    label_dtype = jnp.int8 if C < 127 else jnp.int32   # narrow label stream
    labels = labels.astype(label_dtype).reshape(N, 1, hw_padded)

    kernel = functools.partial(_gdl_tile_kernel, hw=HW, pad=pad)

    partials = pl.pallas_call(
        kernel,
        out_shape=jax.ShapeDtypeStruct((N, hw_splits, C, 3), jnp.float32),
        grid=(N, hw_splits, tiles_per_split),
        in_specs=[
            pl.BlockSpec((1, C, hw_tile),
                         lambda n, s, t: (n, 0, s * tiles_per_split + t)),
            pl.BlockSpec((1, 1, hw_tile),
                         lambda n, s, t: (n, 0, s * tiles_per_split + t)),
        ],
        out_specs=pl.BlockSpec((1, 1, C, 3), lambda n, s, t: (n, s, 0, 0)),
        scratch_shapes=[
            pltpu.VMEM((C, 128), jnp.float32),   # intersection lane-chunk partials
            pltpu.VMEM((C, 128), jnp.float32),   # label-count lane-chunk partials
            pltpu.VMEM((C, 128), jnp.float32),   # prob-sum lane-chunk partials
        ],
        compiler_params=pltpu.CompilerParams(
            dimension_semantics=("parallel", "parallel", "arbitrary")),
    )(pred, labels)

    # Tiny per-class weighted combine (C values) — plain JAX, negligible cost.
    sums = jnp.sum(partials, axis=(0, 1))                 # (C, 3)
    inter, count, psum = sums[:, 0], sums[:, 1], sums[:, 2]
    w = 1.0 / (count ** 2 + eps)
    numerator = jnp.sum(w * inter)
    denominator = jnp.sum(w * (count + psum))
    dice = 2.0 * (numerator + eps) / (denominator + eps)
    return 1.0 - dice


def _reference_gdl(y_pred, y_true, eps=1e-9):
    # Pure-JAX reference reproducing the PyTorch module exactly.
    C = y_pred.shape[1]
    t = jax.nn.one_hot(y_true, C, dtype=jnp.float32)                 # (N, H, W, C)
    p = jnp.transpose(jax.nn.softmax(y_pred, axis=1), (0, 2, 3, 1))  # (N, H, W, C)
    w = 1.0 / (jnp.sum(t, axis=(0, 1, 2)) ** 2 + eps)
    numerator = jnp.sum(w * jnp.sum(t * p, axis=(0, 1, 2)))
    denominator = jnp.sum(w * jnp.sum(t + p, axis=(0, 1, 2)))
    dice = 2.0 * (numerator + eps) / (denominator + eps)
    return 1.0 - dice


if __name__ == "__main__":
    key = jax.random.PRNGKey(0)
    k1, k2, k3, k4 = jax.random.split(key, 4)

    # Case 1: N=2, forced hw_tile=128 -> grid (2, 1, 2): exercises accumulation
    # across the reduction axis plus the deferred last-tile finalize.
    N, C, H, W = 2, 4, 16, 16
    y_pred = jax.random.normal(k1, (N, C, H, W), dtype=jnp.float32)
    y_true = jax.random.randint(k2, (N, H, W), 0, C, dtype=jnp.int32)
    loss1 = generalized_dice_loss(y_pred, y_true, hw_tile=128)
    jax.block_until_ready(loss1)
    ref1 = _reference_gdl(y_pred, y_true)
    assert jnp.allclose(loss1, ref1, atol=1e-5, rtol=1e-5), (loss1, ref1)

    # Case 2: byte-budgeted auto tile (single step per image) on the same data.
    loss2 = generalized_dice_loss(y_pred, y_true)
    jax.block_until_ready(loss2)
    assert jnp.allclose(loss2, ref1, atol=1e-5, rtol=1e-5), (loss2, ref1)

    # Case 3: N=1 with two HW splits (v7x 2-TC path) and non-128-divisible
    # HW = 15*14 = 210 -> exercises padding + the in-kernel validity mask.
    N2, C2, H2, W2 = 1, 5, 15, 14
    y_pred2 = jax.random.normal(k3, (N2, C2, H2, W2), dtype=jnp.float32)
    y_true2 = jax.random.randint(k4, (N2, H2, W2), 0, C2, dtype=jnp.int32)
    loss3 = generalized_dice_loss(y_pred2, y_true2, hw_tile=128, hw_splits=2)
    jax.block_until_ready(loss3)
    ref3 = _reference_gdl(y_pred2, y_true2)
    assert jnp.allclose(loss3, ref3, atol=1e-5, rtol=1e-5), (loss3, ref3)

    print("KERNEL_OK")
</pallas_src>

<mosaic_0001>
module attributes {stable_mosaic.version = 11 : i64} {
  func.func @_gdl_tile_kernel(%arg0: i32, %arg1: i32, %arg2: i32, %arg3: memref<1x4x128xf32, #tpu.memory_space<vmem>>, %arg4: memref<1x1x128xi8, #tpu.memory_space<vmem>>, %arg5: memref<1x1x4x3xf32, #tpu.memory_space<vmem>>, %arg6: memref<4x128xf32, #tpu.memory_space<vmem>>, %arg7: memref<4x128xf32, #tpu.memory_space<vmem>>, %arg8: memref<4x128xf32, #tpu.memory_space<vmem>>) attributes {dimension_semantics = [#tpu.dimension_semantics<parallel>, #tpu.dimension_semantics<parallel>, #tpu.dimension_semantics<arbitrary>], iteration_bounds = array<i64: 2, 1, 2>, scalar_prefetch = 0 : i64, scratch_operands = 3 : i64, tpu.core_type = #tpu.core_type<tc>, window_params = [{transform_indices = @transform_0, window_bounds = array<i64: 1, 4, 128>}, {transform_indices = @transform_1, window_bounds = array<i64: 1, 1, 128>}, {transform_indices = @transform_2, window_bounds = array<i64: 1, 1, 4, 3>}]} {
    %c0_i32 = arith.constant 0 : i32
    %0 = arith.cmpi eq, %arg2, %c0_i32 : i32
    %1 = arith.extui %0 : i1 to i32
    %c0_i32_0 = arith.constant 0 : i32
    %2 = arith.cmpi ne, %1, %c0_i32_0 : i32
    scf.if %2 {
      %cst_20 = arith.constant 0.000000e+00 : f32
      %36 = vector.broadcast %cst_20 : f32 to vector<4x128xf32>
      %c0_21 = arith.constant 0 : index
      %c0_22 = arith.constant 0 : index
      %37 = vector.load %arg6[%c0_21, %c0_22] : memref<4x128xf32, #tpu.memory_space<vmem>>, vector<4x128xf32>
      tpu.vector_store %arg6[%c0_21, %c0_22], %36 {strides = array<i32>} : memref<4x128xf32, #tpu.memory_space<vmem>>, vector<4x128xf32>,
      %cst_23 = arith.constant 0.000000e+00 : f32
      %38 = vector.broadcast %cst_23 : f32 to vector<4x128xf32>
      %c0_24 = arith.constant 0 : index
      %c0_25 = arith.constant 0 : index
      %39 = vector.load %arg7[%c0_24, %c0_25] : memref<4x128xf32, #tpu.memory_space<vmem>>, vector<4x128xf32>
      tpu.vector_store %arg7[%c0_24, %c0_25], %38 {strides = array<i32>} : memref<4x128xf32, #tpu.memory_space<vmem>>, vector<4x128xf32>,
      %cst_26 = arith.constant 0.000000e+00 : f32
      %40 = vector.broadcast %cst_26 : f32 to vector<4x128xf32>
      %c0_27 = arith.constant 0 : index
      %c0_28 = arith.constant 0 : index
      %41 = vector.load %arg8[%c0_27, %c0_28] : memref<4x128xf32, #tpu.memory_space<vmem>>, vector<4x128xf32>
      tpu.vector_store %arg8[%c0_27, %c0_28], %40 {strides = array<i32>} : memref<4x128xf32, #tpu.memory_space<vmem>>, vector<4x128xf32>,
    } else {
    }
    %c0 = arith.constant 0 : index
    %c0_1 = arith.constant 0 : index
    %c0_2 = arith.constant 0 : index
    %3 = vector.load %arg3[%c0, %c0_1, %c0_2] : memref<1x4x128xf32, #tpu.memory_space<vmem>>, vector<1x4x128xf32>
    %4 = vector.shape_cast %3 : vector<1x4x128xf32> to vector<4x128xf32>
    %cst = arith.constant dense<0xFF800000> : vector<128xf32>
    %5 = vector.multi_reduction <maximumf>, %4, %cst [0] : vector<4x128xf32> to vector<128xf32>
    %6 = vector.shape_cast %5 : vector<128xf32> to vector<1x128xf32>
    %7 = vector.broadcast %6 : vector<1x128xf32> to vector<4x128xf32>
    %8 = arith.subf %4, %7 : vector<4x128xf32>
    %9 = math.exp %8 : vector<4x128xf32>
    %cst_3 = arith.constant dense<0.000000e+00> : vector<128xf32>
    %10 = vector.multi_reduction <add>, %9, %cst_3 [0] : vector<4x128xf32> to vector<128xf32>
    %11 = vector.shape_cast %10 : vector<128xf32> to vector<1x128xf32>
    %12 = tpu.reciprocal %11 : vector<1x128xf32> -> vector<1x128xf32>
    %13 = vector.broadcast %12 : vector<1x128xf32> to vector<4x128xf32>
    %14 = arith.mulf %9, %13 : vector<4x128xf32>
    %c0_4 = arith.constant 0 : index
    %c0_5 = arith.constant 0 : index
    %c0_6 = arith.constant 0 : index
    %15 = vector.load %arg4[%c0_4, %c0_5, %c0_6] : memref<1x1x128xi8, #tpu.memory_space<vmem>>, vector<1x1x128xi8>
    %16 = vector.shape_cast %15 : vector<1x1x128xi8> to vector<1x128xi8>
    %17 = arith.extsi %16 : vector<1x128xi8> to vector<1x128xi32>
    %18 = tpu.iota {dimensions = array<i32: 0>} : vector<4x128xi32>
    %19 = vector.broadcast %17 : vector<1x128xi32> to vector<4x128xi32>
    %20 = arith.cmpi eq, %19, %18 : vector<4x128xi32>
    %21 = arith.extui %20 : vector<4x128xi1> to vector<4x128xi32>
    %22 = arith.sitofp %21 : vector<4x128xi32> to vector<4x128xf32>
    %c0_7 = arith.constant 0 : index
    %c0_8 = arith.constant 0 : index
    %23 = vector.load %arg6[%c0_7, %c0_8] : memref<4x128xf32, #tpu.memory_space<vmem>>, vector<4x128xf32>
    %24 = arith.mulf %14, %22 : vector<4x128xf32>
    %25 = arith.addf %23, %24 : vector<4x128xf32>
    %c0_9 = arith.constant 0 : index
    %c0_10 = arith.constant 0 : index
    %26 = vector.load %arg6[%c0_9, %c0_10] : memref<4x128xf32, #tpu.memory_space<vmem>>, vector<4x128xf32>
    tpu.vector_store %arg6[%c0_9, %c0_10], %25 {strides = array<i32>} : memref<4x128xf32, #tpu.memory_space<vmem>>, vector<4x128xf32>,
    %c0_11 = arith.constant 0 : index
    %c0_12 = arith.constant 0 : index
    %27 = vector.load %arg7[%c0_11, %c0_12] : memref<4x128xf32, #tpu.memory_space<vmem>>, vector<4x128xf32>
    %28 = arith.addf %27, %22 : vector<4x128xf32>
    %c0_13 = arith.constant 0 : index
    %c0_14 = arith.constant 0 : index
    %29 = vector.load %arg7[%c0_13, %c0_14] : memref<4x128xf32, #tpu.memory_space<vmem>>, vector<4x128xf32>
    tpu.vector_store %arg7[%c0_13, %c0_14], %28 {strides = array<i32>} : memref<4x128xf32, #tpu.memory_space<vmem>>, vector<4x128xf32>,
    %c0_15 = arith.constant 0 : index
    %c0_16 = arith.constant 0 : index
    %30 = vector.load %arg8[%c0_15, %c0_16] : memref<4x128xf32, #tpu.memory_space<vmem>>, vector<4x128xf32>
    %31 = arith.addf %30, %14 : vector<4x128xf32>
    %c0_17 = arith.constant 0 : index
    %c0_18 = arith.constant 0 : index
    %32 = vector.load %arg8[%c0_17, %c0_18] : memref<4x128xf32, #tpu.memory_space<vmem>>, vector<4x128xf32>
    tpu.vector_store %arg8[%c0_17, %c0_18], %31 {strides = array<i32>} : memref<4x128xf32, #tpu.memory_space<vmem>>, vector<4x128xf32>,
    %c1_i32 = arith.constant 1 : i32
    %33 = arith.cmpi eq, %arg2, %c1_i32 : i32
    %34 = arith.extui %33 : i1 to i32
    %c0_i32_19 = arith.constant 0 : i32
    %35 = arith.cmpi ne, %34, %c0_i32_19 : i32
    scf.if %35 {
      %c0_20 = arith.constant 0 : index
      %c0_21 = arith.constant 0 : index
      %36 = vector.load %arg6[%c0_20, %c0_21] : memref<4x128xf32, #tpu.memory_space<vmem>>, vector<4x128xf32>
      %cst_22 = arith.constant dense<0.000000e+00> : vector<4xf32>
      %37 = vector.multi_reduction <add>, %36, %cst_22 [1] : vector<4x128xf32> to vector<4xf32>
      %38 = vector.shape_cast %37 : vector<4xf32> to vector<4x1xf32>
      %c0_23 = arith.constant 0 : index
      %c0_24 = arith.constant 0 : index
      %39 = vector.load %arg7[%c0_23, %c0_24] : memref<4x128xf32, #tpu.memory_space<vmem>>, vector<4x128xf32>
      %cst_25 = arith.constant dense<0.000000e+00> : vector<4xf32>
      %40 = vector.multi_reduction <add>, %39, %cst_25 [1] : vector<4x128xf32> to vector<4xf32>
      %41 = vector.shape_cast %40 : vector<4xf32> to vector<4x1xf32>
      %c0_26 = arith.constant 0 : index
      %c0_27 = arith.constant 0 : index
      %42 = vector.load %arg8[%c0_26, %c0_27] : memref<4x128xf32, #tpu.memory_space<vmem>>, vector<4x128xf32>
      %cst_28 = arith.constant dense<0.000000e+00> : vector<4xf32>
      %43 = vector.multi_reduction <add>, %42, %cst_28 [1] : vector<4x128xf32> to vector<4xf32>
      %44 = vector.shape_cast %43 : vector<4xf32> to vector<4x1xf32>
      %45 = tpu.concatenate %38, %41, %44 in 1 : vector<4x1xf32>, vector<4x1xf32>, vector<4x1xf32> -> vector<4x3xf32>
      %46 = vector.shape_cast %45 : vector<4x3xf32> to vector<1x1x4x3xf32>
      %c0_29 = arith.constant 0 : index
      %c0_30 = arith.constant 0 : index
      %c0_31 = arith.constant 0 : index
      %c0_32 = arith.constant 0 : index
      %47 = vector.load %arg5[%c0_29, %c0_30, %c0_31, %c0_32] : memref<1x1x4x3xf32, #tpu.memory_space<vmem>>, vector<1x1x4x3xf32>
      tpu.vector_store %arg5[%c0_29, %c0_30, %c0_31, %c0_32], %46 {strides = array<i32>} : memref<1x1x4x3xf32, #tpu.memory_space<vmem>>, vector<1x1x4x3xf32>,
    } else {
    }
    return
  }
  func.func @transform_0(%arg0: i32, %arg1: i32, %arg2: i32) -> (i32, i32, i32) {
    %c2_i32 = arith.constant 2 : i32
    %0 = arith.muli %arg1, %c2_i32 : i32
    %1 = arith.addi %0, %arg2 : i32
    %c0_i32 = arith.constant 0 : i32
    %c0_i32_0 = arith.constant 0 : i32
    return %arg0, %c0_i32, %1 : i32, i32, i32
  }
  func.func @transform_1(%arg0: i32, %arg1: i32, %arg2: i32) -> (i32, i32, i32) {
    %c2_i32 = arith.constant 2 : i32
    %0 = arith.muli %arg1, %c2_i32 : i32
    %1 = arith.addi %0, %arg2 : i32
    %c0_i32 = arith.constant 0 : i32
    %c0_i32_0 = arith.constant 0 : i32
    return %arg0, %c0_i32, %1 : i32, i32, i32
  }
  func.func @transform_2(%arg0: i32, %arg1: i32, %arg2: i32) -> (i32, i32, i32, i32) {
    %c0_i32 = arith.constant 0 : i32
    %c0_i32_0 = arith.constant 0 : i32
    %c0_i32_1 = arith.constant 0 : i32
    return %arg0, %arg1, %c0_i32, %c0_i32_0 : i32, i32, i32, i32
  }
}

</mosaic_0001>

<bundles_post_ra>
// kernel: tpu_custom_call.1
= control target key start
LH: loop header
LB: loop body
LE: loop exit
PB: predicated region body
PF: predicated region fallthrough
CT: control target
= control target key end

     0   :  { %7 = vsyncpa [#allocation6], 0  ;;  %s793_s0 = inlined_call_operand.hbm [shape: f32[2,4,256], index: 0, kind: input, shape index: {}]   ;;  %s794_s1 = inlined_call_operand.vmem [shape: s8[2,1,256], index: 1, kind: input, shape index: {}]   ;;  %s795_s2 = inlined_call_operand.vmem [shape: f32[2,1,4,3], index: 2, kind: output, shape index: {}]  }
   0x1   :  { %9 = vsyncpa [#allocation6 + $0x1], 0  ;;  %s628_s9 = smov 0   ;;  %s630_s10 = smov 0  }
   0x2   :  { %s632_s11 = smov 0   ;;  %s634_s12 = smov 0  }
   0x3   :  { %s636_s13 = smov 0   ;;  %s638_s14 = smov 0  }
   0x4   :  { %s640_s15 = smov 0   ;;  %s642_s16 = smov 0  }
   0x5 LB: > { %s419_s17 = sadd.s32 4294967295, %s608_s16   ;;  %s27_s18 = sadd.s32 1, %s600_s14  ;;  %s608_s16 = sphi %s642_s16, %s15_s16   ;;  %s604_s15 = sphi %s640_s15, %s807_s15   ;;  %s600_s14 = sphi %s638_s14, %s806_s14   ;;  %s596_s13 = sphi %s636_s13, %s805_s13   ;;  %s592_s12 = sphi %s634_s12, %s804_s12   ;;  %s588_s11 = sphi %s632_s11, %s803_s11   ;;  %s584_s10 = sphi %s630_s10, %s802_s10   ;;  %s580_s9 = sphi %s628_s9, %s801_s9  }
   0x6   : > { %p28_p0 = scmp.ge.s32.totalorder %s27_s18, 2  ;;  %s34_s19 = sadd.s32 1, %s604_s15 }
   0x7   : > { %s47_s20 = sadd.s32 1, %s588_s11  ;;  %p54_p1 = scmp.ne.s32.totalorder %s588_s11, %s584_s10 }
   0x8   : > { %s809_s18 = smov (%p28_p0, %s27_s18), 0  ;;  %s811_s19 = smov (!%p28_p0, %s34_s19), %s604_s15 }
   0x9   : > { %s43_s21 = ssub.s32 %s600_s14, %s809_s18  ;;  %p55_p2 = scmp.eq.s32.totalorder %s608_s16, 0 }
   0xa   : > { %p36_p3 = scmp.ge.s32.totalorder %s811_s19, 2  ;;  %p60_p4 = scmp.ne.s32.totalorder %s584_s10, %s580_s9 }
   0xb   : > { %p679_p5 = por %p55_p2, %p54_p1  ;;  %p61_p6 = scmp.eq.s32.totalorder %s419_s17, 0 }
   0xc   : > { %s813_s19 = smov (%p36_p3, %s811_s19), 0  ;;  %p441_p8 = scmp.lt.s32.totalorder %s608_s16, 4 }
   0xd   : > { %p685_p7 = por %p61_p6, %p60_p4  ;;  %s42_s24 = ssub.s32 %s604_s15, %s813_s19 }
   0xe   : > { %s44_s25 = sor.u32 %s43_s21, %s42_s24  ;;  %s144_s26 = sand.u32 1, %s588_s11  }
   0xf   : > { %p45_p9 = scmp.eq.s32.totalorder %s44_s25, 0  ;;  %s423_s27 = sshll.u32 %s144_s26, 2 }
  0x10   : > { %s424_s28 = sshll.u32 %s604_s15, 1  ;;  %s148_s4 = scalar_lea.vmem [#allocation5], %s423_s27 }
  0x11   : > { %s695_s29 = scalar_select %p45_p9, %s588_s11, %s47_s20  }
  0x12   : > { %s155_s30 = sadd.s32 %s600_s14, %s424_s28  ;;  %s159_s5 = sshll.u32 %s148_s4, 4  ;;  %s703_s5 = int_to_ptr.vmem [resolvable:$true] %s159_s5 }
  0x13   : > { %s425_s3 = sshll.u32 %s155_s30, 6  ;;  %p709_p10 = pnand %p441_p8, %p679_p5 }
  0x14   : > { %s701_s8 = scalar_lea.hbm %s793_s0, %s425_s3  ;;  %s145_s17 = scalar_lea.sflag [#allocation6], %s144_s26 }
  0x15   : > { %s512_s20 = scalar_lea.hbm %s701_s8, 64  ;;  %p514_p0 = pneg %p709_p10 }
  0x16   : > { %p513_p13 = scmp.ne.s32.totalorder %s701_s8, %s512_s20  ;;  %s517_s24 = scalar_lea.hbm %s793_s0, 256 }
  0x17   : > { %p518_p3 = scmp.lt.u32.totalorder %s701_s8, %s793_s0  ;;  %p519_p4 = scmp.lt.u32.totalorder %s517_s24, %s512_s20 }
  0x18   : > { %p515_p1 = pnand %p514_p0, %p513_p13  ;;  %p521_p6 = scmp.lt.u32.totalorder %s512_s20, %s701_s8 }
  0x19   : > { %p520_p5 = por %p519_p4, %p518_p3 }
  0x1a   : > { %p516_p2 = pneg %p515_p1 }
  0x1b   : > { %p522_p8 = por %p521_p6, %p520_p5 }
  0x1d   : > { %p523_p9 = pnand %p522_p8, %p516_p2 }
  0x1f   : > { %526 = shalt.err (!%p523_p9)
}
  0x20   : > { %s527_s26 = scalar_lea.vmem %s703_s5, 64  ;;  %s610_s28 = smov [#allocation5]  }
  0x21   : > { %p528_p13 = scmp.ne.s32.totalorder %s703_s5, %s527_s26  ;;  %s532_s30 = sshll.u32 %s610_s28, 4  ;;  %s533_s30 = int_to_ptr.vmem [resolvable:$false] %s532_s30 }
  0x22   : > { %s534_s3 = scalar_lea.vmem %s533_s30, 128  ;;  %p535_p12 = scmp.lt.s32.totalorder %s703_s5, %s533_s30 }
  0x23   : > { %p530_p1 = pnand %p528_p13, %p514_p0  ;;  %p536_p3 = scmp.lt.s32.totalorder %s534_s3, %s527_s26 }
  0x25   : > { %p531_p11 = pneg %p530_p1  ;;  %p537_p4 = por %p536_p3, %p535_p12 }
  0x27   : > { %p538_p5 = pnand %p537_p4, %p531_p11 }
  0x29   : > { %541 = shalt.err (!%p538_p5)
}
  0x2a   : > { %440 = dma.hbm_to_vmem [thread:$0]  (!%p709_p10), %s701_s8, 64, %s703_s5, %s145_s17  }
  0x2b   : > { %p799_p2 = scmp.lt.s32.totalorder %s608_s16, 5  ;;  %p800_p6 = scmp.ge.s32.totalorder %s608_s16, 1 }
  0x2d   : > { %p179_p0 = pnand %p800_p6, %p799_p2 }
  0x2e   : > { %s184_s4 = sand.u32 (!%p179_p0), 1, %s584_s10  }
  0x2f   : > { %182 = sbr.rel (%p179_p0) target bundleno = 285 (0x11d), region = 28  ;;  %s427_s6 = sshll.u32 (!%p179_p0), %s184_s4, 2 }
  0x30   : > { %s185_s7 = scalar_lea.sflag (!%p179_p0), [#allocation6], %s184_s4  ;;  %s188_s20 = scalar_lea.vmem (!%p179_p0), [#allocation5], %s427_s6 }
  0x36   : > { %575 = dma.done.wait (%p685_p7), %s185_s7, 64  }
  0x37   : > { %577 = vsyncadd (%p685_p7), %s185_s7, 4294967232  ;;  %p224_p10 = scmp.lt.s32.totalorder %s596_s13, 1  ;;  %p226_p11 = scmp.lt.s32.totalorder %s592_s12, 1 }
  0x38   : > { %p430_p7 = scmp.ne.s32.totalorder %s592_s12, 0 }
  0x39   : > { %s815_s13 = smov (!%p224_p10, %s596_s13), 1  ;;  %v611_v0 = vmov (!%p430_p7), 0.0  }
  0x3a   : > { %s227_s5 = scalar_select %p226_p11, %s592_s12, 1 }
  0x3b   : > { %s428_s8 = sshll.u32 %s815_s13, 1  ;;  %s429_s9 = sshll.u32 %s815_s13, 2  ;;  %244 = vst [vmem:[#allocation2] sm:$0xf] (!%p430_p7), %v611_v0  ;;  %245 = vst [vmem:[#allocation3] sm:$0xf] (!%p430_p7), %v611_v0 }
  0x3c   : > { %s229_s17 = sadd.s32 %s428_s8, %s227_s5  ;;  %s756_s24 = scalar_lea.vmem %s795_s2, %s429_s9  ;;  %246 = vst [vmem:[#allocation4] sm:$0xf] (!%p430_p7), %v611_v0 }
  0x3d   : > { %s230_s23 = scalar_lea.vmem %s794_s1, %s229_s17  ;;  %243 = sbr.rel (%p430_p7) target bundleno = 68 (0x44), region = 36 }
  0x44 PF: > { %v247_v1 = vld [vmem:[%s188_s20] sm:$0xf]  ;;  %vm248_vm0 = vcmask 1043456   ;;  %v268_v2 = vld [vmem:[%s230_s23] sm:$0x1]  ;;  %v270_v3 = vlaneseq  ;;  %v612_v14 = vmov 0.0  }
  0x45   : > { %v249_v4 = vsel %vm248_vm0, %v247_v1, -inf  ;;  %v269_v6 = vunpack.c.0.s8 %v268_v2  ;;  %v283_v12 = vld [vmem:[#allocation3] sm:$0xf]  ;;  %v286_v30 = vld [vmem:[#allocation4] sm:$0xf]  ;;  %p432_p12 = scmp.ne.s32.totalorder %s592_s12, 1 }
  0x46   : > { %v250_v5 = vrot.slane %v249_v4, 4  ;;  %v271_v7 = vshrl.u32 %v270_v3, 7  ;;  %v279_v32 = vld [vmem:[#allocation2] sm:$0xf]  ;;  %vm305_vm2 = vcmask (!%p432_p12), 7168   ;;  %vm307_vm3 = vcmask (!%p432_p12), 15360  }
  0x47   : > { %vm309_vm4 = vcmask (!%p432_p12), 19456  }
  0x48   : > { %v251_v8 = vmax.f32 %v249_v4, %v250_v5  ;;  %v274_v9 = vsub.s32 0, %v271_v7 }
  0x4a   : > { %v252_v10 = vrot.slane %v251_v8, 2  ;;  %v275_v11 = vrot.slane %v269_v6, %v274_v9 }
  0x4c   : > { %v253_v13 = vmax.f32 %v251_v8, %v252_v10  ;;  %vm276_vm1 = vcmp.eq.s32.totalorder %v275_v11, %v271_v7 }
  0x4d   : > { %v431_v15 = vsel %vm276_vm1, 1.0, %v612_v14 }
  0x4e   : > { %v254_v16 = vrot.slane %v253_v13, 1  ;;  %v284_v17 = vadd.f32 %v431_v15, %v283_v12 }
  0x50   : > { %v255_v18 = vmax.f32 %v253_v13, %v254_v16  ;;  %285 = vst [vmem:[#allocation3] sm:$0xf] %v284_v17 }
  0x52   : > { %v256_v19 = vsub.f32 %v247_v1, %v255_v18 }
  0x54   : > { %v257_v20 = vmul.f32 1.442695, %v256_v19 }
  0x56   : > { %508 = vpow2.f32 %v257_v20 }
  0x57   : > { %v297_v37 = vld [vmem:[#allocation3] sm:$0xf] (!%p432_p12) }
  0x58   : > { %v298_v41 = vsel (!%p432_p12), %vm248_vm0, %v297_v37, 0.0 }
  0x60   : > { %v509_v21 = vpop.eup %508 }
  0x61   : > { %v259_v22 = vsel %vm248_vm0, %v509_v21, 0.0 }
  0x62   : > { %v260_v23 = vrot.slane %v259_v22, 4 }
  0x64   : > { %v261_v24 = vadd.f32 %v260_v23, %v259_v22 }
  0x66   : > { %v262_v25 = vrot.slane %v261_v24, 2 }
  0x68   : > { %v263_v26 = vadd.f32 %v262_v25, %v261_v24 }
  0x6a   : > { %v264_v27 = vrot.slane %v263_v26, 1 }
  0x6c   : > { %v265_v28 = vadd.f32 %v264_v27, %v263_v26 }
  0x6e   : > { %510 = vrcp.f32 %v265_v28 }
  0x78   : > { %v511_v29 = vpop.eup %510 }
  0x79   : > { %v267_v31 = vmul.f32 %v511_v29, %v509_v21  ;;  %292 = sbr.rel (%p432_p12) target bundleno = 285 (0x11d), region = 40 }
  0x7b   : > { %v280_v33 = vmul.f32 %v431_v15, %v267_v31  ;;  %v287_v34 = vadd.f32 %v286_v30, %v267_v31 }
  0x7d   : > { %v281_v35 = vadd.f32 %v280_v33, %v279_v32  ;;  %288 = vst [vmem:[#allocation4] sm:$0xf] %v287_v34 }
  0x7f   : > { %282 = vst [vmem:[#allocation2] sm:$0xf] %v281_v35 }
  0x84   : > { %v301_v38 = vld [vmem:[#allocation4] sm:$0xf] }
  0x85   : > { %v302_v40 = vsel %vm248_vm0, %v301_v38, 0.0 }
  0x86   : > { %v293_v36 = vld [vmem:[#allocation2] sm:$0xf]  ;;  %303 = vadd.xlane.f32.xlu1 %v302_v40 }
  0x87   : > { %v294_v39 = vsel %vm248_vm0, %v293_v36, 0.0 }
  0x88   : > { %295 = vadd.xlane.f32.xlu0 %v294_v39 }
  0x8c   : > { %299 = vadd.xlane.f32.xlu0 %v298_v41 }
 0x113   : > { %v304_v43 = vpop.xlane.xlu1 %303 }
 0x115   : > { %v296_v42 = vpop.xlane.xlu0 %295 }
 0x119   : > { %v300_v44 = vpop.xlane.xlu0 %299 }
 0x11a   : > { %v306_v45 = vsel %vm305_vm2, %v296_v42, %v300_v44 }
 0x11b   : > { %v308_v46 = vsel %vm307_vm3, %v306_v45, %v304_v43 }
 0x11c   : > { %310 = vst.msk [vmem:[%s756_s24] sm:$0xf] %vm309_vm4, %v308_v46 }
 0x11d PF: > { %s15_s16 = sadd.s32 1, %s608_s16   ;;  %s801_s9 = smov %s584_s10 }
 0x11e   : > { %p12_p8 = scmp.ge.s32.totalorder %s15_s16, 6   ;;  %s802_s10 = smov %s588_s11 }
 0x11f   : > { %s803_s11 = smov %s695_s29  ;;  %s804_s12 = smov %s600_s14 }
 0x120   : > { %s805_s13 = smov %s604_s15  ;;  %s806_s14 = smov %s809_s18 }
 0x121   : > { %s807_s15 = smov %s813_s19  ;;  %14 = sbr.rel (!%p12_p8) target bundleno = 5 (0x5), region = 79 }
 0x128   :  { %336 = vsyncpa [#allocation6], 1 }
 0x129   :  { %338 = vsyncpa [#allocation6 + $0x1], 1 }

</bundles_post_ra>
